<compile_context>
chip_gen: v5e
topology: v5e:2x2
jax: 0.10.0
libtpu: 0.0.40
codegen_flags: <defaults>
</compile_context>

<pallas_src>
import numpy as np
import jax
import jax.numpy as jnp
from jax import lax
from jax.experimental import pallas as pl
from jax.experimental.pallas import tpu as pltpu

# ---- static module constants (mirror the PyTorch file) ---------------------
M = 250
SQUARE_SIZE = round(M / 20)  # = 12 (Python banker's rounding, same as the module)

positions = np.array([[0, 1], [0, 4], [0, 7],
                      [3, 0.65], [3, 2.65 + 0.5], [3, 4.65 + 1], [3, 6.65 + 1.5],
                      [6, 1], [6, 4], [6, 7]])  # defined (as in the module) but unused
N_DET = positions.shape[0]                      # 10 detector regions
START_COL = np.zeros(N_DET, dtype=int)          # all zeros, as in the module
START_ROW = np.zeros(N_DET, dtype=int)          # all zeros, as in the module
EPS = 1e-9
LANE_PAD = 128                                  # lane-dense detector output width

# Every detector in this module uses the same (0, 0) window, so a single
# region reduction per batch row covers all 10 detector readings.
UNIQUE_OFFSETS = sorted(set(zip(START_ROW.tolist(), START_COL.tolist())))
assert UNIQUE_OFFSETS == [(0, 0)], (
    "kernel fast path assumes all detectors share the (0, 0) window, "
    "as defined in the original module")


def _imaging_kernel(urc_ref, uic_ref, ur0_ref, ui0_ref, val_ref, inten_ref):
    """Single grid step handling all batch rows at once.

    urc_ref / uic_ref : (B, S, S)   re / im of the detector corner u[:, :S, :S]
    ur0_ref / ui0_ref : (H, W)      re / im of the batch-0 plane u[0]
    val_ref           : (B, 128)    lane-padded normalized detector readings
    inten_ref         : (H, W)      intensity plane for batch 0
    """
    # --- detector values: ONE shared 12x12 region sum per batch row ---------
    urc = urc_ref[...]
    uic = uic_ref[...]
    corner_int = urc * urc + uic * uic                      # |u|^2 on the corner (VPU)
    row_sums = jnp.sum(corner_int, axis=-1)                 # (B, S)   lane reduce (XLU)
    s = jnp.sum(row_sums, axis=-1, keepdims=True)           # (B, 1)   region sum

    # All 10 detectors read the same region sum s, so
    #   dot(values[b], values[b]) = N_DET * s^2.
    inv_norm = lax.rsqrt(jnp.float32(N_DET) * s * s + EPS)  # rsqrt -> EUP slot
    value_row = s * inv_norm                                 # (B, 1)

    # Lane-dense store: every lane holds the shared detector value; the wrapper
    # slices out the first N_DET columns.
    val_ref[...] = jnp.broadcast_to(value_row, val_ref.shape)

    # --- batch-0 intensity plane (the full plane is read exactly once) ------
    ur0 = ur0_ref[...]
    ui0 = ui0_ref[...]
    inten_ref[...] = ur0 * ur0 + ui0 * ui0


def imaging_layer_forward(u):
    """JAX/Pallas equivalent of imaging_layer.forward.

    u : complex64 array of shape (B, H, W)
    returns (value_, inten) with value_ : (B, N_DET) float32,
                                 inten  : (H, W)     float32 (= intensity[0])
    """
    u = jnp.asarray(u)
    B, H, W = u.shape
    S = SQUARE_SIZE

    # Materialize in f32 ONLY what the kernel reads (Pallas TPU has no complex
    # dtype): the (B, S, S) detector corner (~B * 1.2 KB) and the single (H, W)
    # batch-0 plane.  No full-batch real/imag copies of u are created.
    u_corner = u[:, :S, :S]
    ur_c = jnp.real(u_corner).astype(jnp.float32)
    ui_c = jnp.imag(u_corner).astype(jnp.float32)
    ur0 = jnp.real(u[0]).astype(jnp.float32)
    ui0 = jnp.imag(u[0]).astype(jnp.float32)

    values_pad, inten0 = pl.pallas_call(
        _imaging_kernel,
        # Everything fits comfortably in VMEM on every TPU generation
        # (< 1 MiB even at H = W = 250), so a single grid step handles all B
        # batch rows: no per-step overhead, no resident/revisited output block.
        grid=(1,),
        in_specs=[
            pl.BlockSpec((B, S, S), lambda i: (0, 0, 0)),
            pl.BlockSpec((B, S, S), lambda i: (0, 0, 0)),
            pl.BlockSpec((H, W), lambda i: (0, 0)),
            pl.BlockSpec((H, W), lambda i: (0, 0)),
        ],
        out_specs=(
            pl.BlockSpec((B, LANE_PAD), lambda i: (0, 0)),
            pl.BlockSpec((H, W), lambda i: (0, 0)),
        ),
        out_shape=(
            jax.ShapeDtypeStruct((B, LANE_PAD), jnp.float32),
            jax.ShapeDtypeStruct((H, W), jnp.float32),
        ),
        compiler_params=pltpu.CompilerParams(
            dimension_semantics=("arbitrary",),
        ),
    )(ur_c, ui_c, ur0, ui0)

    value_ = values_pad[:, :N_DET]
    # TODO(synk): the module's host-side side effect
    # `inten = intensity[0].cpu().detach().numpy()` (a global numpy array) has
    # no kernel equivalent; the equivalent device array is returned instead.
    return value_, inten0


if __name__ == "__main__":
    # Small shapes consistent with the module (detector window is 12x12, so
    # H, W >= 12): batch=4, H=W=32.
    key = jax.random.PRNGKey(0)
    kr, ki = jax.random.split(key)
    B, H, W = 4, 32, 32
    ur0f = jax.random.normal(kr, (B, H, W), dtype=jnp.float32)
    ui0f = jax.random.normal(ki, (B, H, W), dtype=jnp.float32)
    u = (ur0f + 1j * ui0f).astype(jnp.complex64)

    value_, inten = imaging_layer_forward(u)
    jax.block_until_ready(value_)
    jax.block_until_ready(inten)

    # Lightweight sanity check against a pure-JAX reference.
    intensity_ref = ur0f * ur0f + ui0f * ui0f
    s = jnp.sum(intensity_ref[:, :SQUARE_SIZE, :SQUARE_SIZE], axis=(1, 2))
    vals_ref = jnp.broadcast_to(s[:, None], (B, N_DET))
    nrm_ref = jnp.sqrt(jnp.sum(vals_ref * vals_ref, axis=1, keepdims=True) + EPS)
    value_ref = vals_ref / nrm_ref

    assert value_.shape == (B, N_DET)
    assert inten.shape == (H, W)
    assert jnp.allclose(value_, value_ref, rtol=1e-5, atol=1e-5)
    assert jnp.allclose(inten, intensity_ref[0], rtol=1e-5, atol=1e-5)

    print("KERNEL_OK")
</pallas_src>

<mosaic_0001>
module attributes {stable_mosaic.version = 11 : i64} {
  func.func @_imaging_kernel(%arg0: i32, %arg1: memref<4x12x12xf32, #tpu.memory_space<vmem>>, %arg2: memref<4x12x12xf32, #tpu.memory_space<vmem>>, %arg3: memref<32x32xf32, #tpu.memory_space<vmem>>, %arg4: memref<32x32xf32, #tpu.memory_space<vmem>>, %arg5: memref<4x128xf32, #tpu.memory_space<vmem>>, %arg6: memref<32x32xf32, #tpu.memory_space<vmem>>) attributes {dimension_semantics = [#tpu.dimension_semantics<arbitrary>], iteration_bounds = array<i64: 1>, scalar_prefetch = 0 : i64, scratch_operands = 0 : i64, tpu.core_type = #tpu.core_type<tc>, window_params = [{pipeline_mode = #tpu.pipeline_mode<synchronous>, transform_indices = @transform_0, window_bounds = array<i64: 4, 12, 12>}, {pipeline_mode = #tpu.pipeline_mode<synchronous>, transform_indices = @transform_1, window_bounds = array<i64: 4, 12, 12>}, {pipeline_mode = #tpu.pipeline_mode<synchronous>, transform_indices = @transform_2, window_bounds = array<i64: 32, 32>}, {pipeline_mode = #tpu.pipeline_mode<synchronous>, transform_indices = @transform_3, window_bounds = array<i64: 32, 32>}, {pipeline_mode = #tpu.pipeline_mode<synchronous>, transform_indices = @transform_4, window_bounds = array<i64: 4, 128>}, {pipeline_mode = #tpu.pipeline_mode<synchronous>, transform_indices = @transform_5, window_bounds = array<i64: 32, 32>}]} {
    %c0 = arith.constant 0 : index
    %c0_0 = arith.constant 0 : index
    %c0_1 = arith.constant 0 : index
    %0 = vector.load %arg1[%c0, %c0_0, %c0_1] : memref<4x12x12xf32, #tpu.memory_space<vmem>>, vector<4x12x12xf32>
    %c0_2 = arith.constant 0 : index
    %c0_3 = arith.constant 0 : index
    %c0_4 = arith.constant 0 : index
    %1 = vector.load %arg2[%c0_2, %c0_3, %c0_4] : memref<4x12x12xf32, #tpu.memory_space<vmem>>, vector<4x12x12xf32>
    %2 = arith.mulf %0, %0 : vector<4x12x12xf32>
    %3 = arith.mulf %1, %1 : vector<4x12x12xf32>
    %4 = arith.addf %2, %3 : vector<4x12x12xf32>
    %cst = arith.constant dense<0.000000e+00> : vector<4x12xf32>
    %5 = vector.multi_reduction <add>, %4, %cst [2] : vector<4x12x12xf32> to vector<4x12xf32>
    %cst_5 = arith.constant dense<0.000000e+00> : vector<4xf32>
    %6 = vector.multi_reduction <add>, %5, %cst_5 [1] : vector<4x12xf32> to vector<4xf32>
    %7 = vector.shape_cast %6 : vector<4xf32> to vector<4x1xf32>
    %cst_6 = arith.constant 1.000000e+01 : f32
    %8 = vector.broadcast %cst_6 : f32 to vector<4x1xf32>
    %9 = arith.mulf %8, %7 : vector<4x1xf32>
    %10 = arith.mulf %9, %7 : vector<4x1xf32>
    %cst_7 = arith.constant 9.99999971E-10 : f32
    %11 = vector.broadcast %cst_7 : f32 to vector<4x1xf32>
    %12 = arith.addf %10, %11 : vector<4x1xf32>
    %13 = math.rsqrt %12 : vector<4x1xf32>
    %14 = arith.mulf %7, %13 : vector<4x1xf32>
    %15 = vector.shape_cast %14 : vector<4x1xf32> to vector<4x1xf32>
    %16 = vector.broadcast %15 : vector<4x1xf32> to vector<4x128xf32>
    %c0_8 = arith.constant 0 : index
    %c0_9 = arith.constant 0 : index
    %17 = vector.load %arg5[%c0_8, %c0_9] : memref<4x128xf32, #tpu.memory_space<vmem>>, vector<4x128xf32>
    tpu.vector_store %arg5[%c0_8, %c0_9], %16 {strides = array<i32>} : memref<4x128xf32, #tpu.memory_space<vmem>>, vector<4x128xf32>,
    %c0_10 = arith.constant 0 : index
    %c0_11 = arith.constant 0 : index
    %18 = vector.load %arg3[%c0_10, %c0_11] : memref<32x32xf32, #tpu.memory_space<vmem>>, vector<32x32xf32>
    %c0_12 = arith.constant 0 : index
    %c0_13 = arith.constant 0 : index
    %19 = vector.load %arg4[%c0_12, %c0_13] : memref<32x32xf32, #tpu.memory_space<vmem>>, vector<32x32xf32>
    %20 = arith.mulf %18, %18 : vector<32x32xf32>
    %21 = arith.mulf %19, %19 : vector<32x32xf32>
    %22 = arith.addf %20, %21 : vector<32x32xf32>
    %c0_14 = arith.constant 0 : index
    %c0_15 = arith.constant 0 : index
    %23 = vector.load %arg6[%c0_14, %c0_15] : memref<32x32xf32, #tpu.memory_space<vmem>>, vector<32x32xf32>
    tpu.vector_store %arg6[%c0_14, %c0_15], %22 {strides = array<i32>} : memref<32x32xf32, #tpu.memory_space<vmem>>, vector<32x32xf32>,
    return
  }
  func.func @transform_0(%arg0: i32) -> (i32, i32, i32) {
    %c0_i32 = arith.constant 0 : i32
    %c0_i32_0 = arith.constant 0 : i32
    %c0_i32_1 = arith.constant 0 : i32
    %c0_i32_2 = arith.constant 0 : i32
    return %c0_i32, %c0_i32_0, %c0_i32_1 : i32, i32, i32
  }
  func.func @transform_1(%arg0: i32) -> (i32, i32, i32) {
    %c0_i32 = arith.constant 0 : i32
    %c0_i32_0 = arith.constant 0 : i32
    %c0_i32_1 = arith.constant 0 : i32
    %c0_i32_2 = arith.constant 0 : i32
    return %c0_i32, %c0_i32_0, %c0_i32_1 : i32, i32, i32
  }
  func.func @transform_2(%arg0: i32) -> (i32, i32) {
    %c0_i32 = arith.constant 0 : i32
    %c0_i32_0 = arith.constant 0 : i32
    %c0_i32_1 = arith.constant 0 : i32
    return %c0_i32, %c0_i32_0 : i32, i32
  }
  func.func @transform_3(%arg0: i32) -> (i32, i32) {
    %c0_i32 = arith.constant 0 : i32
    %c0_i32_0 = arith.constant 0 : i32
    %c0_i32_1 = arith.constant 0 : i32
    return %c0_i32, %c0_i32_0 : i32, i32
  }
  func.func @transform_4(%arg0: i32) -> (i32, i32) {
    %c0_i32 = arith.constant 0 : i32
    %c0_i32_0 = arith.constant 0 : i32
    %c0_i32_1 = arith.constant 0 : i32
    return %c0_i32, %c0_i32_0 : i32, i32
  }
  func.func @transform_5(%arg0: i32) -> (i32, i32) {
    %c0_i32 = arith.constant 0 : i32
    %c0_i32_0 = arith.constant 0 : i32
    %c0_i32_1 = arith.constant 0 : i32
    return %c0_i32, %c0_i32_0 : i32, i32
  }
}

</mosaic_0001>

<bundles_post_ra>
// kernel: tpu_custom_call.1
= control target key start
LH: loop header
LB: loop body
LE: loop exit
PB: predicated region body
PF: predicated region fallthrough
CT: control target
= control target key end

     0   :  { %11 = vsyncpa [#allocation3], 0  ;;  %vm61_vm0 = vcmask 97280   ;;  %s378_s0 = inlined_call_operand.vmem [shape: f32[4,12,12], index: 0, kind: input, shape index: {}]   ;;  %s379_s1 = inlined_call_operand.vmem [shape: f32[4,12,12], index: 1, kind: input, shape index: {}]   ;;  %s380_s2 = inlined_call_operand.vmem [shape: f32[32,32], index: 2, kind: input, shape index: {}]   ;;  %s381_s3 = inlined_call_operand.vmem [shape: f32[32,32], index: 3, kind: input, shape index: {}]   ;;  %s382_s4 = inlined_call_operand.hbm [shape: f32[4,128], index: 4, kind: output, shape index: {0}]   ;;  %s383_s5 = inlined_call_operand.hbm [shape: f32[32,32], index: 5, kind: output, shape index: {1}]  }
   0x1   :  { %v25_v0 = vld [vmem:[%s378_s0 + $0x20] sm:$0xff]  ;;  %v23_v2 = vld [vmem:[%s378_s0 + $0x10] sm:$0xff]  ;;  %v26_v12 = vld [vmem:[%s378_s0 + $0x28] sm:$0xf] }
   0x2   :  { %v33_v1 = vld [vmem:[%s379_s1 + $0x20] sm:$0xff]  ;;  %v41_v3 = vmul.f32 %v25_v0, %v25_v0  ;;  %v31_v5 = vld [vmem:[%s379_s1 + $0x10] sm:$0xff]  ;;  %v39_v6 = vmul.f32 %v23_v2, %v23_v2  ;;  %v34_v13 = vld [vmem:[%s379_s1 + $0x28] sm:$0xf]  ;;  %v42_v16 = vmul.f32 %v26_v12, %v26_v12 }
   0x3   :  { %v49_v4 = vmul.f32 %v33_v1, %v33_v1  ;;  %v21_v7 = vld [vmem:[%s378_s0] sm:$0xff]  ;;  %v47_v9 = vmul.f32 %v31_v5, %v31_v5  ;;  %v24_v14 = vld [vmem:[%s378_s0 + $0x18] sm:$0xf]  ;;  %v50_v17 = vmul.f32 %v34_v13, %v34_v13  ;;  %v22_v20 = vld [vmem:[%s378_s0 + $0x8] sm:$0xf] }
   0x4   :  { %v29_v8 = vld [vmem:[%s379_s1] sm:$0xff]  ;;  %v37_v10 = vmul.f32 %v21_v7, %v21_v7  ;;  %v32_v18 = vld [vmem:[%s379_s1 + $0x18] sm:$0xf]  ;;  %v40_v19 = vmul.f32 %v24_v14, %v24_v14  ;;  %v30_v21 = vld [vmem:[%s379_s1 + $0x8] sm:$0xf]  ;;  %v38_v25 = vmul.f32 %v22_v20, %v22_v20 }
   0x5   :  { %v45_v11 = vmul.f32 %v29_v8, %v29_v8  ;;  %v57_v15 = vadd.f32 %v49_v4, %v41_v3  ;;  %v55_v22 = vadd.f32 %v47_v9, %v39_v6  ;;  %v48_v24 = vmul.f32 %v32_v18, %v32_v18 }
   0x6   :  { %v46_v27 = vmul.f32 %v30_v21, %v30_v21 }
   0x7   :  { %v53_v23 = vadd.f32 %v45_v11, %v37_v10  ;;  %v75_v26 = vsel %vm61_vm0, %v57_v15, 0.0 }
   0x8   :  { %12 = vsyncpa [#allocation5], 0  ;;  %76 = vadd.xlane.f32.xlu2 %v75_v26  ;;  %v69_v28 = vsel %vm61_vm0, %v55_v22, 0.0  ;;  %v58_v30 = vadd.f32 %v50_v17, %v42_v16  ;;  %vm65_vm1 = vcmask 93184   ;;  %v56_v31 = vadd.f32 %v48_v24, %v40_v19  ;;  %v28_v33 = vld [vmem:[%s378_s0 + $0x38] sm:$0xf] }
   0x9   :  { %v62_v29 = vsel %vm61_vm0, %v53_v23, 0.0  ;;  %70 = vadd.xlane.f32.xlu1 %v69_v28  ;;  %v54_v32 = vadd.f32 %v46_v27, %v38_v25  ;;  %v36_v34 = vld [vmem:[%s379_s1 + $0x38] sm:$0xf]  ;;  %v27_v35 = vld [vmem:[%s378_s0 + $0x30] sm:$0xff]  ;;  %v44_v38 = vmul.f32 %v28_v33, %v28_v33  ;;  %v95_v48 = vlaneseq  ;;  %v136_v11 = vld [vmem:[%s380_s2] sm:$0xff]  ;;  %s178_s17 = sshll.u32 %s383_s5, 4  ;;  %s179_s17 = int_to_ptr.hbm [resolvable:$true] %s178_s17 }
   0xa   :  { %63 = vadd.xlane.f32.xlu0 %v62_v29  ;;  %v35_v36 = vld [vmem:[%s379_s1 + $0x30] sm:$0xff]  ;;  %v78_v37 = vsel %vm65_vm1, %v58_v30, 0.0  ;;  %v52_v39 = vmul.f32 %v36_v34, %v36_v34  ;;  %v72_v40 = vsel %vm65_vm1, %v56_v31, 0.0  ;;  %v43_v42 = vmul.f32 %v27_v35, %v27_v35  ;;  %v137_v12 = vld [vmem:[%s380_s2 + $0x8] sm:$0xff]  ;;  %v139_v14 = vld [vmem:[%s380_s2 + $0x18] sm:$0xff]  ;;  %s255_s18 = smov 8  }
   0xb   :  { %v66_v41 = vsel %vm65_vm1, %v54_v32, 0.0  ;;  %v51_v43 = vmul.f32 %v35_v36, %v35_v36  ;;  %v96_v52 = vand.u32 127, %v95_v48  ;;  %vm100_vm2 = vcmask 130112   ;;  %v138_v13 = vld [vmem:[%s380_s2 + $0x10] sm:$0xff]  ;;  %v140_v15 = vld [vmem:[%s381_s3] sm:$0xff]  ;;  %v141_v16 = vld [vmem:[%s381_s3 + $0x8] sm:$0xff] }
   0xc   :  { %v60_v44 = vadd.f32 %v52_v39, %v44_v38  ;;  %vm111_vm3 = vcmask 1041409   ;;  %vm113_vm4 = vcmask 1042434   ;;  %vm115_vm5 = vcmask 1043459   ;;  %v142_v20 = vld [vmem:[%s381_s3 + $0x10] sm:$0xff]  ;;  %v143_v21 = vld [vmem:[%s381_s3 + $0x18] sm:$0xff]  ;;  %s253_s2 = smov [#allocation4]  }
   0xd   :  { %v59_v45 = vadd.f32 %v51_v43, %v43_v42  ;;  %v98_v53 = vadd.s32 4294967288, %v96_v52  ;;  %v144_v17 = vmul.f32 %v136_v11, %v136_v11  ;;  %v145_v18 = vmul.f32 %v137_v12, %v137_v12  ;;  %s176_s14 = sshll.u32 %s253_s2, 4  ;;  %s254_s3 = smov 128   ;;  %s177_s14 = int_to_ptr.vmem [resolvable:$true] %s176_s14 }
   0xe   :  { %v84_v46 = vsel %vm65_vm1, %v60_v44, 0.0  ;;  %v146_v19 = vmul.f32 %v138_v13, %v138_v13  ;;  %v147_v22 = vmul.f32 %v139_v14, %v139_v14  ;;  %v148_v23 = vmul.f32 %v140_v15, %v140_v15  ;;  %s256_s5 = smov [#allocation2]   ;;  %s168_s22 = sshll.u32 %s382_s4, 4  ;;  %s169_s22 = int_to_ptr.hbm [resolvable:$true] %s168_s22 }
   0xf   :  { %v81_v47 = vsel %vm61_vm0, %v59_v45, 0.0  ;;  %v149_v24 = vmul.f32 %v141_v16, %v141_v16  ;;  %v150_v25 = vmul.f32 %v142_v20, %v142_v20  ;;  %v151_v26 = vmul.f32 %v143_v21, %v143_v21  ;;  %s166_s19 = sshll.u32 %s256_s5, 4  ;;  %s167_s19 = int_to_ptr.vmem [resolvable:$true] %s166_s19 }
  0x10   :  { %79 = vadd.xlane.f32.xlu2 %v78_v37  ;;  %v152_v27 = vadd.f32 %v148_v23, %v144_v17  ;;  %vm156_vm6 = vcmask 261120  }
  0x11   :  { %73 = vadd.xlane.f32.xlu1 %v72_v40  ;;  %v153_v28 = vadd.f32 %v149_v24, %v145_v18  ;;  %v154_v29 = vadd.f32 %v150_v25, %v146_v19  ;;  %v155_v30 = vadd.f32 %v151_v26, %v147_v22 }
  0x12   :  { %67 = vadd.xlane.f32.xlu0 %v66_v41  ;;  %157 = vst.msk [vmem:[#allocation4] sm:$0xff] %vm156_vm6, %v152_v27 }
  0x13   :  { %158 = vst.msk [vmem:[#allocation4 + $0x8] sm:$0xff] %vm156_vm6, %v153_v28 }
  0x14   :  { %159 = vst.msk [vmem:[#allocation4 + $0x10] sm:$0xff] %vm156_vm6, %v154_v29 }
  0x15   :  { %160 = vst.msk [vmem:[#allocation4 + $0x18] sm:$0xff] %vm156_vm6, %v155_v30 }
  0x16   :  { %184 = dma.vmem_to_hbm [thread:$0]  %s177_s14, 512, %s179_s17, [#allocation5], %s254_s3, %s254_s3, %s255_s18  }
  0x19   :  { %85 = vadd.xlane.f32.xlu1 %v84_v46 }
  0x1a   :  { %82 = vadd.xlane.f32.xlu0 %v81_v47 }
  0x7b   :  { %v77_v49 = vpop.xlane.xlu2 %76 }
  0x7c   :  { %v71_v50 = vpop.xlane.xlu1 %70  ;;  %v105_v61 = vperm.slane %v77_v49, %v96_v52 }
  0x7d   :  { %v64_v51 = vpop.xlane.xlu0 %63  ;;  %v102_v59 = vperm.slane %v71_v50, %v96_v52 }
  0x7e   :  { %v97_v60 = vperm.slane %v64_v51, %v96_v52 }
  0x83   :  { %v80_v56 = vpop.xlane.xlu2 %79 }
  0x84   :  { %v74_v54 = vpop.xlane.xlu1 %73  ;;  %v106_v62 = vperm.slane %v80_v56, %v98_v53 }
  0x85   :  { %v68_v55 = vpop.xlane.xlu0 %67  ;;  %v103_v57 = vperm.slane %v74_v54, %v98_v53 }
  0x86   :  { %v99_v58 = vperm.slane %v68_v55, %v98_v53  ;;  %v107_v1 = vsel %vm100_vm2, %v106_v62, %v105_v61 }
  0x87   :  { %v104_v63 = vsel %vm100_vm2, %v103_v57, %v102_v59 }
  0x88   :  { %v101_v0 = vsel %vm100_vm2, %v99_v58, %v97_v60 }
  0x89   :  { %v112_v4 = vsel %vm111_vm3, %v104_v63, %v101_v0 }
  0x8a   :  { %v114_v8 = vsel %vm113_vm4, %v107_v1, %v112_v4 }
  0x8c   :  { %v86_v2 = vpop.xlane.xlu1 %85 }
  0x8d   :  { %v83_v3 = vpop.xlane.xlu0 %82  ;;  %v109_v5 = vperm.slane %v86_v2, %v98_v53 }
  0x8e   :  { %v108_v6 = vperm.slane %v83_v3, %v96_v52 }
  0x90   :  { %v110_v7 = vsel %vm100_vm2, %v109_v5, %v108_v6 }
  0x91   :  { %v116_v9 = vsel %vm115_vm5, %v110_v7, %v114_v8 }
  0x92   :  { %v118_v10 = vsel %vm65_vm1, %v116_v9, 0.0 }
  0x93   :  { %119 = vadd.xlane.f32.xlu2 %v118_v10 }
 0x106   :  { %v120_v31 = vpop.xlane.xlu2 %119 }
 0x107   :  { %v121_v32 = vmul.f32 10.0, %v120_v31 }
 0x109   :  { %v122_v33 = vmul.f32 %v121_v32, %v120_v31 }
 0x10b   :  { %v123_v34 = vadd.f32 1e-09, %v122_v33 }
 0x10d   :  { %199 = vrsqrt.f32 %v123_v34  ;;  %vm130_vm8 = vweird.f32 %v123_v34 }
 0x113   :  { %v200_v35 = vpop.eup %199 }
 0x114   :  { %v125_v36 = vmul.f32 %v200_v35, %v123_v34  ;;  %vm131_vm7 = vweird.f32 %v200_v35 }
 0x115   :  { %vm132_vm9 = vmor %vm130_vm8, %vm131_vm7 }
 0x116   :  { %v126_v37 = vmul.f32 %v200_v35, %v125_v36 }
 0x118   :  { %v127_v38 = vmul.f32 0.5, %v126_v37 }
 0x11a   :  { %v128_v39 = vsub.f32 1.5, %v127_v38 }
 0x11c   :  { %v129_v40 = vmul.f32 %v200_v35, %v128_v39 }
 0x11e   :  { %v133_v41 = vsel %vm132_vm9, %v200_v35, %v129_v40 }
 0x11f   :  { %v134_v42 = vmul.f32 %v133_v41, %v120_v31 }
 0x121   :  { %135 = vst [vmem:[#allocation2] sm:$0xf] %v134_v42 }
 0x122   :  { %171 = dma.vmem_to_hbm [thread:$0]  %s167_s19, 64, %s169_s22, [#allocation3]  }
 0x123   :  { %249 = dma.done.wait [#allocation3], 64  }
 0x124   :  { %250 = vsyncadd [#allocation3], 4294967232 }
 0x125   :  { %251 = dma.done.wait [#allocation5], 512  }
 0x126   :  { %252 = vsyncadd [#allocation5], 4294966784 }
 0x127   :  { %193 = vsyncpa [#allocation3], 1 }
 0x128   :  { %194 = vsyncpa [#allocation5], 1 }

</bundles_post_ra>
